<compile_context>
chip_gen: v7x
topology: tpu7x:2x2x1
jax: 0.10.0
libtpu: 0.0.40
codegen_flags: <defaults>
</compile_context>

<pallas_src>
import jax
import jax.numpy as jnp
from jax.experimental import pallas as pl
from jax.experimental.pallas import tpu as pltpu


def _critic_kernel(x_ref, w1_ref, b1_ref, w2_ref, b2_ref, out_ref):
    # First linear on the MXU: (TB, S) @ (S, H), f32 accumulation.
    h = jnp.dot(x_ref[...], w1_ref[...], preferred_element_type=jnp.float32)
    h = jnp.maximum(h + b1_ref[...], 0.0)              # bias + ReLU on the VPU
    # Second linear (hidden -> 1) as VPU multiply + XLU lane reduce instead of
    # an N=1 MXU matmul; add the SMEM scalar bias.
    v = jnp.sum(h * w2_ref[...], axis=-1)              # (TB,)
    v = v + b2_ref[0]
    # Lane-dense writeback: batch lives on the lane axis of the (1, TB) tile.
    # (The sublane->lane relayout is one XLU op per tile; far off the critical
    #  path, and it avoids an extra wrapper-side transpose pass over x.)
    out_ref[...] = v.reshape(1, -1).astype(out_ref.dtype)


def _round_up(x, m):
    return ((x + m - 1) // m) * m


def _cdiv(a, b):
    return -(-a // b)


_MAX_TB = 1024    # rows per grid step for large batches (multiple of 128; sweepable)
_SMALL_B = 256    # at/below this, use one full-array block (no padding/rounding)


def _choose_tiling(B):
    """Return (TB, B_pad, G) for the batch grid."""
    if B <= _SMALL_B:
        # Block shape == full array dims satisfies the (8,128) rule exactly;
        # single grid step, zero padding, zero wasted rows.
        return B, B, 1
    # Large batch: TB a multiple of 128 (lane-dense output tiles), capped so the
    # grid has >= 2 steps -> both v7x TensorCores are used; at most _MAX_TB.
    TB = min(_MAX_TB, _round_up(_cdiv(B, 2), 128))
    G = _cdiv(B, TB)
    return TB, G * TB, G


@jax.jit
def critic_forward(x, w1, b1, w2, b2):
    """x: (B, S); w1: (S, H); b1: (1, H); w2: (1, H); b2: (1,) -> (B, 1)."""
    B, S = x.shape
    H = w1.shape[1]

    TB, B_pad, G = _choose_tiling(B)

    out_row = pl.pallas_call(
        _critic_kernel,
        # Only the tiny output is "padded" (via its shape); x is never copied.
        out_shape=jax.ShapeDtypeStruct((1, B_pad), x.dtype),
        grid=(G,),
        in_specs=[
            # x tile (pipelined / double-buffered); last block may be a partial
            # (OOB-padded) read when TB does not divide B -- rows are
            # independent, so the garbage rows only feed sliced-off lanes.
            pl.BlockSpec((TB, S), lambda i: (i, 0)),
            pl.BlockSpec((S, H), lambda i: (0, 0)),              # w1 resident in VMEM
            pl.BlockSpec((1, H), lambda i: (0, 0)),              # b1 resident in VMEM
            pl.BlockSpec((1, H), lambda i: (0, 0)),              # w2 row resident in VMEM
            pl.BlockSpec(memory_space=pltpu.MemorySpace.SMEM),   # b2 scalar in SMEM
        ],
        out_specs=pl.BlockSpec((1, TB), lambda i: (0, i)),       # lane-dense output row
        compiler_params=pltpu.CompilerParams(
            dimension_semantics=("parallel",),                   # megacore on v7x
            vmem_limit_bytes=32 * 1024 * 1024,                   # well under v7x 64 MiB
        ),
    )(x, w1, b1, w2, b2)

    return out_row[0, :B].reshape(B, 1)


def xavier_uniform(key, shape, dtype=jnp.float32):
    # matches nn.init.xavier_uniform_ (gain=1): U(-a, a), a = sqrt(6/(fan_in+fan_out))
    fan_in, fan_out = shape
    a = (6.0 / (fan_in + fan_out)) ** 0.5
    return jax.random.uniform(key, shape, dtype=dtype, minval=-a, maxval=a)


def init_critic_params(key, state_space, hidden_size=64, dtype=jnp.float32):
    # init_type='xavier': weights xavier_uniform, biases zero (deterministic via PRNGKey)
    k1, k2 = jax.random.split(key)
    w1 = xavier_uniform(k1, (state_space, hidden_size), dtype)  # linear_in.weight^T
    b1 = jnp.zeros((1, hidden_size), dtype)                     # linear_in.bias
    w2 = xavier_uniform(k2, (1, hidden_size), dtype)            # state_value.weight
    b2 = jnp.zeros((1,), dtype)                                 # state_value.bias
    return w1, b1, w2, b2


def _reference(x, w1, b1, w2, b2):
    return jnp.maximum(x @ w1 + b1, 0.0) @ w2.T + b2


if __name__ == "__main__":
    key = jax.random.PRNGKey(0)
    kx, kp = jax.random.split(key)

    # Small shapes consistent with the module.
    batch, state_space, hidden = 8, 32, 64
    x = jax.random.normal(kx, (batch, state_space), dtype=jnp.float32)
    w1, b1, w2, b2 = init_critic_params(kp, state_space, hidden)

    # Tiny-batch fast path: single full-array block, no padding.
    value = jax.block_until_ready(critic_forward(x, w1, b1, w2, b2))
    ref = _reference(x, w1, b1, w2, b2)
    assert value.shape == (batch, 1), value.shape
    assert jnp.allclose(value, ref, atol=1e-4, rtol=1e-4), "mismatch vs reference (small)"

    # Non-tile-aligned batch: exercises the 2-step parallel grid + partial last block.
    big_batch = 300
    xb = jax.random.normal(jax.random.PRNGKey(1), (big_batch, state_space), jnp.float32)
    vb = jax.block_until_ready(critic_forward(xb, w1, b1, w2, b2))
    refb = _reference(xb, w1, b1, w2, b2)
    assert vb.shape == (big_batch, 1), vb.shape
    assert jnp.allclose(vb, refb, atol=1e-4, rtol=1e-4), "mismatch vs reference (tiled)"

    # Large batch: exercises TB=1024 tiles, multi-step grid, partial last block.
    huge_batch = 3000
    xh = jax.random.normal(jax.random.PRNGKey(2), (huge_batch, state_space), jnp.float32)
    vh = jax.block_until_ready(critic_forward(xh, w1, b1, w2, b2))
    refh = _reference(xh, w1, b1, w2, b2)
    assert vh.shape == (huge_batch, 1), vh.shape
    assert jnp.allclose(vh, refh, atol=1e-4, rtol=1e-4), "mismatch vs reference (large)"

    print("KERNEL_OK")
</pallas_src>

<mosaic_0001>
module attributes {stable_mosaic.version = 11 : i64} {
  func.func @_critic_kernel(%arg0: i32, %arg1: memref<8x32xf32, #tpu.memory_space<vmem>>, %arg2: memref<32x64xf32, #tpu.memory_space<vmem>>, %arg3: memref<1x64xf32, #tpu.memory_space<vmem>>, %arg4: memref<1x64xf32, #tpu.memory_space<vmem>>, %arg5: memref<1xf32, #tpu.memory_space<smem>>, %arg6: memref<1x8xf32, #tpu.memory_space<vmem>>) attributes {dimension_semantics = [#tpu.dimension_semantics<parallel>], iteration_bounds = array<i64: 1>, scalar_prefetch = 0 : i64, scratch_operands = 0 : i64, tpu.core_type = #tpu.core_type<tc>, window_params = [{transform_indices = @transform_0, window_bounds = array<i64: 8, 32>}, {pipeline_mode = #tpu.pipeline_mode<synchronous>, transform_indices = @transform_1, window_bounds = array<i64: 32, 64>}, {pipeline_mode = #tpu.pipeline_mode<synchronous>, transform_indices = @transform_2, window_bounds = array<i64: 1, 64>}, {pipeline_mode = #tpu.pipeline_mode<synchronous>, transform_indices = @transform_3, window_bounds = array<i64: 1, 64>}, {transform_indices = @transform_4, window_bounds = array<i64: 1>}, {transform_indices = @transform_5, window_bounds = array<i64: 1, 8>}]} {
    %c0 = arith.constant 0 : index
    %c0_0 = arith.constant 0 : index
    %0 = vector.load %arg1[%c0, %c0_0] : memref<8x32xf32, #tpu.memory_space<vmem>>, vector<8x32xf32>
    %c0_1 = arith.constant 0 : index
    %c0_2 = arith.constant 0 : index
    %1 = vector.load %arg2[%c0_1, %c0_2] : memref<32x64xf32, #tpu.memory_space<vmem>>, vector<32x64xf32>
    %cst = arith.constant dense<0.000000e+00> : vector<8x64xf32>
    %2 = tpu.matmul %0, %1, %cst {dimension_numbers = #tpu.dot_dimension_numbers<[1], [0], [0], [1], [0, 0, 1, 1], [], []>} : vector<8x32xf32>, vector<32x64xf32>, vector<8x64xf32> -> vector<8x64xf32>
    %c0_3 = arith.constant 0 : index
    %c0_4 = arith.constant 0 : index
    %3 = vector.load %arg3[%c0_3, %c0_4] : memref<1x64xf32, #tpu.memory_space<vmem>>, vector<1x64xf32>
    %4 = vector.broadcast %3 : vector<1x64xf32> to vector<8x64xf32>
    %5 = arith.addf %2, %4 : vector<8x64xf32>
    %cst_5 = arith.constant 0.000000e+00 : f32
    %6 = vector.broadcast %cst_5 : f32 to vector<8x64xf32>
    %7 = arith.maximumf %5, %6 : vector<8x64xf32>
    %c0_6 = arith.constant 0 : index
    %c0_7 = arith.constant 0 : index
    %8 = vector.load %arg4[%c0_6, %c0_7] : memref<1x64xf32, #tpu.memory_space<vmem>>, vector<1x64xf32>
    %9 = vector.broadcast %8 : vector<1x64xf32> to vector<8x64xf32>
    %10 = arith.mulf %7, %9 : vector<8x64xf32>
    %cst_8 = arith.constant dense<0.000000e+00> : vector<8xf32>
    %11 = vector.multi_reduction <add>, %10, %cst_8 [1] : vector<8x64xf32> to vector<8xf32>
    %c0_9 = arith.constant 0 : index
    %12 = memref.load %arg5[%c0_9] : memref<1xf32, #tpu.memory_space<smem>>
    %13 = vector.broadcast %12 : f32 to vector<8xf32>
    %14 = arith.addf %11, %13 : vector<8xf32>
    %15 = vector.shape_cast %14 : vector<8xf32> to vector<1x8xf32>
    %c0_10 = arith.constant 0 : index
    %c0_11 = arith.constant 0 : index
    %16 = vector.load %arg6[%c0_10, %c0_11] : memref<1x8xf32, #tpu.memory_space<vmem>>, vector<1x8xf32>
    tpu.vector_store %arg6[%c0_10, %c0_11], %15 {strides = array<i32>} : memref<1x8xf32, #tpu.memory_space<vmem>>, vector<1x8xf32>,
    return
  }
  func.func @transform_0(%arg0: i32) -> (i32, i32) {
    %c0_i32 = arith.constant 0 : i32
    %c0_i32_0 = arith.constant 0 : i32
    return %arg0, %c0_i32 : i32, i32
  }
  func.func @transform_1(%arg0: i32) -> (i32, i32) {
    %c0_i32 = arith.constant 0 : i32
    %c0_i32_0 = arith.constant 0 : i32
    %c0_i32_1 = arith.constant 0 : i32
    return %c0_i32, %c0_i32_0 : i32, i32
  }
  func.func @transform_2(%arg0: i32) -> (i32, i32) {
    %c0_i32 = arith.constant 0 : i32
    %c0_i32_0 = arith.constant 0 : i32
    %c0_i32_1 = arith.constant 0 : i32
    return %c0_i32, %c0_i32_0 : i32, i32
  }
  func.func @transform_3(%arg0: i32) -> (i32, i32) {
    %c0_i32 = arith.constant 0 : i32
    %c0_i32_0 = arith.constant 0 : i32
    %c0_i32_1 = arith.constant 0 : i32
    return %c0_i32, %c0_i32_0 : i32, i32
  }
  func.func @transform_4(%arg0: i32) -> i32 {
    %c0_i32 = arith.constant 0 : i32
    %c0_i32_0 = arith.constant 0 : i32
    return %c0_i32 : i32
  }
  func.func @transform_5(%arg0: i32) -> (i32, i32) {
    %c0_i32 = arith.constant 0 : i32
    %c0_i32_0 = arith.constant 0 : i32
    return %c0_i32, %arg0 : i32, i32
  }
}

</mosaic_0001>

<bundles_post_ra>
// kernel: critic_forward.1
= control target key start
LH: loop header
LB: loop body
LE: loop exit
PB: predicated region body
PF: predicated region fallthrough
CT: control target
= control target key end

     0   :  { %11 = vsyncpa [#allocation4], 0  ;;  %s371_s0 = inlined_call_operand.hbm [shape: f32[8,32], index: 0, kind: input, shape index: {}]   ;;  %s372_s1 = inlined_call_operand.hbm [shape: f32[32,64], index: 1, kind: input, shape index: {}]   ;;  %s373_s2 = inlined_call_operand.vmem [shape: f32[1,64], index: 2, kind: input, shape index: {}]   ;;  %s374_s3 = inlined_call_operand.vmem [shape: f32[1,64], index: 3, kind: input, shape index: {}]   ;;  %s375_s4 = inlined_call_operand.<no memory space> [shape: f32[1], index: 4, kind: input, shape index: {}]   ;;  %s376_s5 = inlined_call_operand.hbm [shape: f32[1,8], index: 5, kind: output, shape index: {}]  }
   0x1   :  { %12 = vsyncpa [#allocation7], 0 }
   0x2   :  { %13 = vsyncpa [#allocation5], 0  ;;  %s281_s18 = smov [#allocation3]   ;;  %s282_s20 = smov [#allocation6]  }
   0x3   :  { %s20_s19 = sshll.u32 %s281_s18, 4  ;;  %s29_s21 = sshll.u32 %s282_s20, 4  ;;  %s21_s19 = int_to_ptr.vmem [resolvable:$true] %s20_s19  ;;  %s319_s21 = int_to_ptr.vmem [resolvable:$true] %s29_s21 }
   0x4   :  { %s209_s24 = scalar_lea.hbm %s371_s0, 128 }
   0x5   :  { %p210_p0 = scmp.ne.s32.totalorder %s371_s0, %s209_s24  ;;  %p213_p1 = scmp.lt.u32.totalorder %s209_s24, %s371_s0 }
   0x7   :  { %p215_p2 = pnand %p213_p1, %p210_p0 }
   0x9   :  { %218 = shalt.err (!%p215_p2)
}
   0xa   :  { %s219_s29 = scalar_lea.vmem %s21_s19, 128  ;;  %p224_p4 = scmp.lt.s32.totalorder %s21_s19, %s21_s19 }
   0xb   :  { %p220_p3 = scmp.ne.s32.totalorder %s21_s19, %s219_s29  ;;  %p225_p5 = scmp.lt.s32.totalorder %s219_s29, %s219_s29 }
   0xd   :  { %p226_p6 = por %p225_p5, %p224_p4 }
   0xf   :  { %p227_p7 = pnand %p226_p6, %p220_p3 }
  0x11   :  { %230 = shalt.err (!%p227_p7)
}
  0x12   :  { %23 = dma.hbm_to_vmem [thread:$0]  %s371_s0, 128, %s21_s19, [#allocation4]  }
  0x13   :  { %s231_s9 = scalar_lea.hbm %s372_s1, 512 }
  0x14   :  { %p232_p8 = scmp.ne.s32.totalorder %s372_s1, %s231_s9  ;;  %p235_p9 = scmp.lt.u32.totalorder %s231_s9, %s372_s1 }
  0x16   :  { %p237_p10 = pnand %p235_p9, %p232_p8 }
  0x18   :  { %240 = shalt.err (!%p237_p10)
}
  0x19   :  { %s241_s14 = scalar_lea.vmem %s319_s21, 512  ;;  %p246_p12 = scmp.lt.s32.totalorder %s319_s21, %s319_s21 }
  0x1a   :  { %p242_p11 = scmp.ne.s32.totalorder %s319_s21, %s241_s14  ;;  %p247_p13 = scmp.lt.s32.totalorder %s241_s14, %s241_s14 }
  0x1c   :  { %p248_p0 = por %p247_p13, %p246_p12 }
  0x1e   :  { %p249_p1 = pnand %p248_p0, %p242_p11 }
  0x20   :  { %252 = shalt.err (!%p249_p1)
}
  0x21   :  { %s283_s0 = smov 128   ;;  %s284_s15 = smov 8  }
  0x22   :  { %35 = dma.hbm_to_vmem [thread:$0]  %s372_s1, 512, %s319_s21, [#allocation7], %s283_s0, %s283_s0, %s284_s15  }
  0x23   :  { %275 = dma.done.wait [#allocation4], 128  }
  0x24   :  { %276 = vsyncadd [#allocation4], 4294967168 }
  0x25   :  { %277 = dma.done.wait [#allocation7], 512  }
  0x26   :  { %278 = vsyncadd [#allocation7], 4294966784  ;;  %v285_v0 = vmov 0.0|0.0   ;;  %vm286_vm0 = vmmov 0   ;;  %v287_v1 = vmov 0.0   ;;  %v49_v2 = vld [vmem:[#allocation6] sm:$0xff]  ;;  %v151_v17 = vlaneseq }
  0x27   :  { %195 = vmatprep.subr.bf16.mxu0 %v285_v0  ;;  %192 = vmatprep.mubr.msk.f32.mxu0 %vm286_vm0, %v287_v1  ;;  %v50_v3 = vld [vmem:[#allocation6 + $0x8] sm:$0xff]  ;;  %v51_v4 = vld [vmem:[#allocation6 + $0x10] sm:$0xff]  ;;  %v52_v6 = vld [vmem:[#allocation6 + $0x18] sm:$0xff]  ;;  %vm60_vm1 = vcmask 261120   ;;  %vm143_vm2 = vcmask 523264   ;;  %v148_v20 = vstv %s375_s4  ;;  %vm158_vm3 = vcmask 57344  }
  0x28   :  { %v196_v5 = vpack.c.bf16 %v50_v3, %v49_v2  ;;  %v199_v7 = vpack.c.bf16 %v52_v6, %v51_v4  ;;  %v48_v8 = vld [vmem:[#allocation3] sm:$0xff]  ;;  %v152_v18 = vand.u32 127, %v151_v17  ;;  %v154_v19 = vshrl.u32 %v151_v17, 7 }
  0x29   :  { %v176_v9 = vld [vmem:[%s373_s2] ss:$0 sm:$0xff]  ;;  %s288_s2 = smov [#allocation8]  }
  0x2a   :  { %197 = vmatpush3.bf16.msra.mxu0 %v196_v5  ;;  %v178_v13 = vld [vmem:[%s374_s3] ss:$0 sm:$0xff]  ;;  %v155_v21 = vsub.s32 %v152_v18, %v154_v19  ;;  %s166_s23 = sshll.u32 %s288_s2, 4  ;;  %s167_s23 = int_to_ptr.vmem [resolvable:$true] %s166_s23 }
  0x2b   :  { %198 = vmatprep.subr.bf16.mxu0 %v285_v0  ;;  %s253_s3 = scalar_lea.vmem %s167_s23, 16  ;;  %s257_s24 = scalar_lea.vmem %s167_s23, 32 }
  0x2c   :  { %p254_p2 = scmp.ne.s32.totalorder %s167_s23, %s253_s3  ;;  %p258_p3 = scmp.lt.s32.totalorder %s167_s23, %s167_s23 }
  0x2d   :  { %p259_p4 = scmp.lt.s32.totalorder %s257_s24, %s253_s3 }
  0x2e   :  { %200 = vmatpush3.bf16.msra.mxu0 %v199_v7 }
  0x2f   :  { %p260_p5 = por %p259_p4, %p258_p3 }
  0x31   :  { %193 = vmatmul.mubr.msk.f32.vlgmr.msra.gmra.mrb[0].mxu0 %vm60_vm1, %v48_v8  ;;  %p261_p6 = pnand %p260_p5, %p254_p2 }
 0x104   :  { %v130_v10 = vpop.f32.mrb[0].mxu0 }
 0x105   :  { %v131_v11 = vadd.f32 %v176_v9, %v130_v10  ;;  %v194_v12 = vpop.f32.mrb[1].mxu0 }
 0x107   :  { %v134_v14 = vmax.f32 %v131_v11, 0.0 }
 0x109   :  { %v142_v15 = vmul.f32 %v178_v13, %v134_v14 }
 0x10b   :  { %v144_v16 = vsel %vm143_vm2, %v142_v15, 0.0 }
 0x10c   :  { %145 = vadd.xlane.f32.xlu0 %v144_v16 }
 0x199   :  { %v146_v22 = vpop.xlane.xlu0 %145 }
 0x19a   :  { %v149_v23 = vadd.f32 %v148_v20, %v146_v22 }
 0x19c   :  { %v156_v24 = vrot.slane %v149_v23, %v155_v21 }
 0x19e   :  { %159 = vst.msk [vmem:[#allocation8] sm:$0x1] %vm158_vm3, %v156_v24 }
 0x19f   :  { %264 = shalt.err (!%p261_p6)
}
 0x1a0   :  { %s265_s4 = scalar_lea.hbm %s376_s5, 16 }
 0x1a1   :  { %p266_p7 = scmp.ne.s32.totalorder %s376_s5, %s265_s4  ;;  %p269_p8 = scmp.lt.u32.totalorder %s265_s4, %s376_s5 }
 0x1a3   :  { %p271_p9 = pnand %p269_p8, %p266_p7 }
 0x1a5   :  { %274 = shalt.err (!%p271_p9)
}
 0x1a6   :  { %169 = dma.vmem_to_hbm [thread:$0]  %s167_s23, 16, %s376_s5, [#allocation5]  }
 0x1a7   :  { %279 = dma.done.wait [#allocation5], 16  }
 0x1a8   :  { %280 = vsyncadd [#allocation5], 4294967280 }
 0x1a9   :  { %173 = vsyncpa [#allocation4], 1 }
 0x1aa   :  { %174 = vsyncpa [#allocation7], 1 }
 0x1ab   :  { %175 = vsyncpa [#allocation5], 1 }

</bundles_post_ra>
